<compile_context>
chip_gen: v7x
topology: tpu7x:2x2x1
jax: 0.10.0
libtpu: 0.0.40
codegen_flags: <defaults>
</compile_context>

<pallas_src>
import functools

import jax
import jax.numpy as jnp
import numpy as np
from jax import lax
from jax.experimental import pallas as pl
from jax.experimental.pallas import tpu as pltpu

EPS_BN = 1e-5
_MIB = 1024 * 1024


# ----------------------------------------------------------------------------
# Generation-aware VMEM budgets
# ----------------------------------------------------------------------------
def _device_vmem_capacity():
    try:
        info = pltpu.get_tpu_info()
        cap = int(getattr(info, "vmem_capacity_bytes", 0) or 0)
        if cap > 0:
            return cap
    except Exception:
        pass
    return 64 * _MIB  # conservative default: v7x per-TensorCore VMEM


def _vmem_limit_bytes():
    cap = _device_vmem_capacity()
    if cap >= 96 * _MIB:                       # v5e / v6e: 128 MiB physical
        return int(min(cap - 16 * _MIB, 112 * _MIB))
    return int(max(cap - 16 * _MIB, 32 * _MIB))  # v7x: ~48 MiB with headroom


def _compiler_params(sems, vmem_limit):
    return pltpu.CompilerParams(dimension_semantics=sems,
                                vmem_limit_bytes=int(vmem_limit))


def _choose_point_tile(BN, c, budget_bytes, cap=16384):
    """Largest lane tile (multiple of 128 dividing BN) fitting the VMEM budget."""
    # double-buffered residents per lane: x(f32) + feat(f32) + q/k/v(bf16)
    per_lane = 2 * (c * 4 + c * 4 + 3 * c * 2) + 64
    t = min(BN, cap, max(128, budget_bytes // per_lane))
    t -= t % 128
    t = max(t, 128)
    while t > 128 and BN % t != 0:
        t -= 128
    if BN % t != 0:
        t = BN
    return t


def _choose_query_tile(B, N, C, H, budget_bytes):
    """Largest query tile fitting VMEM, counting softmax temps and outputs."""
    def need(tq):
        sc_t = 2 * tq * N * 2                      # bf16 sc tile (double-buffered)
        kv = 2 * 2 * C * N * 2 + 2 * C * N * 4     # bf16 k/v blocks + f32 upcasts
        q_feat = 2 * C * tq * (2 + 4)              # q bf16 + feat f32 tiles
        outs = 2 * 2 * C * tq * 4                  # out + normed f32 tiles
        temps = 3 * H * tq * N * 4                 # attn / p / w f32 softmax temps
        return sc_t + kv + q_feat + outs + temps + _MIB

    tq = min(N, 2048)
    tq -= tq % 128
    tq = max(tq, 128)
    while tq > 128 and (N % tq != 0 or need(tq) > budget_bytes):
        tq -= 128
    if N % tq != 0:
        tq = N
    # Expose >=2 independent grid steps for v7x megacore when possible.
    if B * (N // tq) < 2:
        t = tq - 128
        while t >= 128:
            if N % t == 0 and B * (N // t) >= 2 and need(t) <= budget_bytes:
                tq = t
                break
            t -= 128
    return tq


# ----------------------------------------------------------------------------
# Pallas kernels
# ----------------------------------------------------------------------------
def _split_heads(x2d, num_heads, head_dim):
    """[C, T] -> [H, Dh, T] bf16 MXU operand.

    The row split is done in f32 when Dh is not a multiple of the bf16 packed
    sublane tile (16) so the reshape stays (8,128)-tile aligned.
    """
    if x2d.dtype != jnp.float32 and head_dim % 16 != 0:
        x2d = x2d.astype(jnp.float32)
    x3 = x2d.reshape(num_heads, head_dim, x2d.shape[-1])
    return x3.astype(jnp.bfloat16)


def _pointcn_qkv_kernel(x_ref, wp_ref, bp_ref, wqkv_ref, bqkv_ref,
                        f_ref, q_ref, k_ref, v_ref, *, C):
    """PointCN (conv + folded BN + ReLU) fused with the stacked q/k/v proj.

    x_ref:    (C_in, TN)  wp_ref: (C, C_in) bf16   bp_ref: (C, 1) f32
    wqkv_ref: (3C, C) bf16   bqkv_ref: (3C, 1) f32
    f_ref: (C, TN) f32   q/k/v_ref: (C, TN) bf16
    (BN affine and 1/sqrt(head_dim) are folded into the weights on the host;
    for layer 0 the init conv is folded in as well.)
    """
    xb = x_ref[...].astype(jnp.bfloat16)
    f = jnp.dot(wp_ref[...], xb, preferred_element_type=jnp.float32) + bp_ref[...]
    f = jnp.maximum(f, 0.0)
    f_ref[...] = f.astype(f_ref.dtype)

    qkv = jnp.dot(wqkv_ref[...], f.astype(jnp.bfloat16),
                  preferred_element_type=jnp.float32) + bqkv_ref[...]
    q_ref[...] = qkv[0:C, :].astype(q_ref.dtype)
    k_ref[...] = qkv[C:2 * C, :].astype(k_ref.dtype)
    v_ref[...] = qkv[2 * C:3 * C, :].astype(v_ref.dtype)


def _attn_mlp_kernel(sc_ref, q_ref, k_ref, v_ref, feat_ref,
                     w0_ref, b0_ref, w1_ref, b1_ref, w2_ref, b2_ref,
                     out_ref, *opt_refs, num_heads, head_dim, emit_norm):
    """Fused multi-head non-local attention + message MLP + residual (+L2 norm).

    Grid step = (batch b, query-tile t).
      sc_ref:   (1, TQ, N) bf16   q_ref: (C, TQ) bf16   k/v_ref: (C, N) bf16
      feat_ref: (C, TQ) f32 (residual input)
      w*/b*:    message MLP, BN folded, weights bf16 / biases f32
      out_ref:  (C, TQ) f32       norm_ref (last layer): (C, TQ) f32
    """
    norm_ref = opt_refs[0] if emit_norm else None
    C = num_heads * head_dim

    sc = sc_ref[0].astype(jnp.float32)                       # [TQ, N]
    q3 = _split_heads(q_ref[...], num_heads, head_dim)       # [H, Dh, TQ]
    k3 = _split_heads(k_ref[...], num_heads, head_dim)       # [H, Dh, N]
    v3 = _split_heads(v_ref[...], num_heads, head_dim)       # [H, Dh, N]

    # All heads in one batched dot (one lhs relayout per tile, not one XLU
    # transpose per head per step); bf16 operands, f32 accumulation.
    # attn[h, o, i] = sum_d q3[h, d, o] * k3[h, d, i]  (1/sqrt(Dh) folded in q)
    attn = lax.dot_general(q3, k3, (((1,), (1,)), ((0,), (0,))),
                           preferred_element_type=jnp.float32)   # [H, TQ, N]
    logits = sc[None, :, :] * attn
    m = jnp.max(logits, axis=-1, keepdims=True)
    p = jnp.exp(logits - m)
    w = p * pl.reciprocal(jnp.sum(p, axis=-1, keepdims=True), approx=True)

    # msg[h, d, o] = sum_i v3[h, d, i] * w[h, o, i]   (NT form, MXU-native)
    msg3 = lax.dot_general(v3, w.astype(jnp.bfloat16),
                           (((2,), (2,)), ((0,), (0,))),
                           preferred_element_type=jnp.float32)   # [H, Dh, TQ]
    msg = msg3.reshape(C, msg3.shape[-1])                        # [C, TQ]

    h0 = jnp.maximum(
        jnp.dot(w0_ref[...], msg.astype(jnp.bfloat16),
                preferred_element_type=jnp.float32) + b0_ref[...], 0.0)
    h1 = jnp.maximum(
        jnp.dot(w1_ref[...], h0.astype(jnp.bfloat16),
                preferred_element_type=jnp.float32) + b1_ref[...], 0.0)
    m2 = jnp.dot(w2_ref[...], h1.astype(jnp.bfloat16),
                 preferred_element_type=jnp.float32) + b2_ref[...]

    out = feat_ref[...].astype(jnp.float32) + m2                 # residual
    out_ref[...] = out.astype(out_ref.dtype)

    if emit_norm:
        ssq = jnp.sum(out * out, axis=0, keepdims=True)
        inv = lax.rsqrt(jnp.maximum(ssq, 1e-24))                 # EUP rsqrt
        norm_ref[...] = (out * inv).astype(norm_ref.dtype)


# ----------------------------------------------------------------------------
# pallas_call wrappers
# ----------------------------------------------------------------------------
def pointcn_qkv(x_flat, wp, bp, wqkv, bqkv, tile_n, vmem_limit):
    """Fused PointCN + stacked q/k/v projection.  Returns (feat2, q, k, v)."""
    C_in, BN = x_flat.shape
    C = wp.shape[0]
    kern = functools.partial(_pointcn_qkv_kernel, C=C)
    out_shape = (jax.ShapeDtypeStruct((C, BN), jnp.float32),
                 jax.ShapeDtypeStruct((C, BN), jnp.bfloat16),
                 jax.ShapeDtypeStruct((C, BN), jnp.bfloat16),
                 jax.ShapeDtypeStruct((C, BN), jnp.bfloat16))
    out_spec = pl.BlockSpec((C, tile_n), lambda i: (0, i))
    return pl.pallas_call(
        kern,
        out_shape=out_shape,
        grid=(BN // tile_n,),
        in_specs=[
            pl.BlockSpec((C_in, tile_n), lambda i: (0, i)),
            pl.BlockSpec((C, C_in), lambda i: (0, 0)),
            pl.BlockSpec((C, 1), lambda i: (0, 0)),
            pl.BlockSpec((3 * C, C), lambda i: (0, 0)),
            pl.BlockSpec((3 * C, 1), lambda i: (0, 0)),
        ],
        out_specs=[out_spec, out_spec, out_spec, out_spec],
        compiler_params=_compiler_params(("parallel",), vmem_limit),
    )(x_flat, wp, bp, wqkv, bqkv)


def attn_mlp_residual(sc, q, k, v, feat2, mlp, num_heads, tq, emit_norm, vmem_limit):
    """Fused attention + message MLP + residual (+ L2 norm on last layer)."""
    C, BN = feat2.shape
    B, N, _ = sc.shape
    nq = N // tq
    head_dim = C // num_heads
    Ch = mlp["w0"].shape[0]

    kern = functools.partial(_attn_mlp_kernel, num_heads=num_heads,
                             head_dim=head_dim, emit_norm=emit_norm)

    in_specs = [
        pl.BlockSpec((1, tq, N), lambda b, t: (b, t, 0)),            # sc rows (bf16)
        pl.BlockSpec((C, tq), lambda b, t: (0, b * nq + t)),         # q tile
        pl.BlockSpec((C, N), lambda b, t: (0, b)),                   # k (full batch)
        pl.BlockSpec((C, N), lambda b, t: (0, b)),                   # v (full batch)
        pl.BlockSpec((C, tq), lambda b, t: (0, b * nq + t)),         # residual feat
        pl.BlockSpec((Ch, C), lambda b, t: (0, 0)),
        pl.BlockSpec((Ch, 1), lambda b, t: (0, 0)),
        pl.BlockSpec((Ch, Ch), lambda b, t: (0, 0)),
        pl.BlockSpec((Ch, 1), lambda b, t: (0, 0)),
        pl.BlockSpec((C, Ch), lambda b, t: (0, 0)),
        pl.BlockSpec((C, 1), lambda b, t: (0, 0)),
    ]
    out_spec = pl.BlockSpec((C, tq), lambda b, t: (0, b * nq + t))
    if emit_norm:
        out_shape = (jax.ShapeDtypeStruct((C, BN), jnp.float32),
                     jax.ShapeDtypeStruct((C, BN), jnp.float32))
        out_specs = [out_spec, out_spec]
    else:
        out_shape = jax.ShapeDtypeStruct((C, BN), jnp.float32)
        out_specs = out_spec

    return pl.pallas_call(
        kern,
        out_shape=out_shape,
        grid=(B, nq),
        in_specs=in_specs,
        out_specs=out_specs,
        compiler_params=_compiler_params(("parallel", "parallel"), vmem_limit),
    )(sc, q, k, v, feat2,
      mlp["w0"], mlp["b0"], mlp["w1"], mlp["b1"], mlp["w2"], mlp["b2"])


# ----------------------------------------------------------------------------
# Parameters (deterministic synthetic init -- shapes match the nn.Module)
# ----------------------------------------------------------------------------
class Config:
    def __init__(self, in_dim, num_layers, num_channels, num_heads, lb_dim=0):
        self.in_dim = in_dim
        self.num_layers = num_layers
        self.num_channels = num_channels
        self.num_heads = num_heads
        self.lb_dim = lb_dim


def _conv_params(key, c_out, c_in):
    k1, k2 = jax.random.split(key)
    w = jax.random.normal(k1, (c_out, c_in), jnp.float32) / np.sqrt(c_in)
    b = 0.05 * jax.random.normal(k2, (c_out,), jnp.float32)
    return {"w": w, "b": b}


def _bn_params(key, c):
    k1, k2, k3, k4 = jax.random.split(key, 4)
    return {
        "gamma": 1.0 + 0.1 * jax.random.normal(k1, (c,), jnp.float32),
        "beta": 0.05 * jax.random.normal(k2, (c,), jnp.float32),
        "mean": 0.05 * jax.random.normal(k3, (c,), jnp.float32),
        "var": 0.5 + jnp.abs(jax.random.normal(k4, (c,), jnp.float32)),
    }


def bn_affine(bn):
    scale = bn["gamma"] / jnp.sqrt(bn["var"] + EPS_BN)
    shift = bn["beta"] - bn["mean"] * scale
    return scale, shift


def init_params(key, cfg):
    C, Ch = cfg.num_channels, cfg.num_channels // 2
    params = {}
    key, k = jax.random.split(key)
    params["init_mlp"] = _conv_params(k, C, cfg.in_dim)
    for i in range(cfg.num_layers):
        key, k1, k2, kq, kk, kv = jax.random.split(key, 6)
        params[f"PointCN_layer_{i}"] = dict(_conv_params(k1, C, C),
                                            bn=_bn_params(k2, C))
        key, m0, m1, m2, b0, b1 = jax.random.split(key, 6)
        params[f"NonLocal_layer_{i}"] = {
            "q": _conv_params(kq, C, C),
            "k": _conv_params(kk, C, C),
            "v": _conv_params(kv, C, C),
            "mlp": {
                "c0": _conv_params(m0, Ch, C), "bn0": _bn_params(b0, Ch),
                "c1": _conv_params(m1, Ch, Ch), "bn1": _bn_params(b1, Ch),
                "c2": _conv_params(m2, C, Ch),
            },
        }
    return params


def prepare_params(params, cfg):
    """Host-side folding: BN affine, 1/sqrt(head_dim), init conv into layer 0,
    and bf16 casts of all MXU weight operands (biases stay f32)."""
    C = cfg.num_channels
    head_dim = C // cfg.num_heads
    inv_sqrt = 1.0 / np.sqrt(head_dim)
    bf16 = jnp.bfloat16

    w_init = params["init_mlp"]["w"]            # (C, in_dim)
    b_init = params["init_mlp"]["b"]            # (C,)

    prep = {}
    for i in range(cfg.num_layers):
        pcn = params[f"PointCN_layer_{i}"]
        s, t = bn_affine(pcn["bn"])
        wp = pcn["w"] * s[:, None]
        bp = pcn["b"] * s + t
        if i == 0:
            # Fold init conv (linear, no activation in between) into layer 0.
            bp = wp @ b_init + bp
            wp = wp @ w_init                    # (C, in_dim)

        nl = params[f"NonLocal_layer_{i}"]
        wq = nl["q"]["w"] * inv_sqrt
        bq = nl["q"]["b"] * inv_sqrt
        wqkv = jnp.concatenate([wq, nl["k"]["w"], nl["v"]["w"]], axis=0)
        bqkv = jnp.concatenate([bq, nl["k"]["b"], nl["v"]["b"]], axis=0)

        m = nl["mlp"]
        s0, t0 = bn_affine(m["bn0"])
        s1, t1 = bn_affine(m["bn1"])
        mlp = {
            "w0": (m["c0"]["w"] * s0[:, None]).astype(bf16),
            "b0": (m["c0"]["b"] * s0 + t0).reshape(-1, 1),
            "w1": (m["c1"]["w"] * s1[:, None]).astype(bf16),
            "b1": (m["c1"]["b"] * s1 + t1).reshape(-1, 1),
            "w2": m["c2"]["w"].astype(bf16),
            "b2": m["c2"]["b"].reshape(-1, 1),
        }
        prep[f"layer_{i}"] = {"wp": wp.astype(bf16), "bp": bp.reshape(-1, 1),
                              "wqkv": wqkv.astype(bf16),
                              "bqkv": bqkv.reshape(-1, 1), "mlp": mlp}
    return prep


# ----------------------------------------------------------------------------
# Forward pass (Pallas kernels for all hot-path compute)
# ----------------------------------------------------------------------------
def nonlocal_net_forward(params, corr_pos, spatial_compat, cfg):
    B, N, in_dim = corr_pos.shape
    C = cfg.num_channels
    H = cfg.num_heads
    assert cfg.num_layers >= 1
    assert N % 128 == 0, "N must be a multiple of 128 (lane-aligned tiles)"
    assert C % H == 0 and (C // H) % 8 == 0, \
        "head_dim must be a multiple of 8 (sublane-aligned head slices)"
    # TODO(synk): pad N to a multiple of 128 for arbitrary point counts.

    BN = B * N
    vmem_limit = _vmem_limit_bytes()
    tile_n = _choose_point_tile(BN, C, int(0.9 * vmem_limit))
    tq = _choose_query_tile(B, N, C, H, int(0.85 * vmem_limit))
    prep = prepare_params(params, cfg)

    # [B, N, in_dim] -> flat [in_dim, B*N] (channels on sublanes, points on lanes)
    x_flat = jnp.transpose(corr_pos, (2, 0, 1)).reshape(in_dim, BN)
    sc_bf16 = spatial_compat.astype(jnp.bfloat16)

    feat = x_flat  # init conv is folded into layer 0's PointCN weights
    normed = None
    for i in range(cfg.num_layers):
        lp = prep[f"layer_{i}"]
        feat2, q, k, v = pointcn_qkv(feat, lp["wp"], lp["bp"],
                                     lp["wqkv"], lp["bqkv"], tile_n, vmem_limit)
        last = (i == cfg.num_layers - 1)
        out = attn_mlp_residual(sc_bf16, q, k, v, feat2, lp["mlp"],
                                H, tq, emit_norm=last, vmem_limit=vmem_limit)
        if last:
            feat, normed = out
        else:
            feat = out

    corr_feat = jnp.transpose(feat.reshape(C, B, N), (1, 0, 2))
    normed_corr_feat = jnp.transpose(normed.reshape(C, B, N), (1, 0, 2))
    return corr_feat, normed_corr_feat


# ----------------------------------------------------------------------------
# Pure numpy reference (float64) for correctness checking
# ----------------------------------------------------------------------------
def ref_forward(params, corr_pos, sc, cfg):
    P = jax.tree_util.tree_map(lambda a: np.asarray(a, np.float64), params)
    x = np.asarray(corr_pos, np.float64).transpose(0, 2, 1)
    sc = np.asarray(sc, np.float64)

    def conv(x, p):
        return np.einsum("oc,bcn->bon", p["w"], x) + p["b"][None, :, None]

    def bn(x, p):
        s = p["gamma"] / np.sqrt(p["var"] + EPS_BN)
        return (x - p["mean"][None, :, None]) * s[None, :, None] + p["beta"][None, :, None]

    def softmax(z):
        z = z - z.max(-1, keepdims=True)
        e = np.exp(z)
        return e / e.sum(-1, keepdims=True)

    feat = conv(x, P["init_mlp"])
    H, C = cfg.num_heads, cfg.num_channels
    Dh = C // H
    for i in range(cfg.num_layers):
        pcn = P[f"PointCN_layer_{i}"]
        feat = np.maximum(bn(conv(feat, pcn), pcn["bn"]), 0.0)
        nl = P[f"NonLocal_layer_{i}"]
        B, _, N = feat.shape
        Q = conv(feat, nl["q"]).reshape(B, H, Dh, N)
        K = conv(feat, nl["k"]).reshape(B, H, Dh, N)
        V = conv(feat, nl["v"]).reshape(B, H, Dh, N)
        attn = np.einsum("bhco,bhci->bhoi", Q, K) / np.sqrt(Dh)
        w = softmax(sc[:, None, :, :] * attn)
        msg = np.einsum("bhoi,bhci->bhco", w, V).reshape(B, C, N)
        m = nl["mlp"]
        msg = np.maximum(bn(conv(msg, m["c0"]), m["bn0"]), 0.0)
        msg = np.maximum(bn(conv(msg, m["c1"]), m["bn1"]), 0.0)
        msg = conv(msg, m["c2"])
        feat = feat + msg
    norm = np.sqrt((feat ** 2).sum(1, keepdims=True))
    normed = feat / np.maximum(norm, 1e-12)
    return feat, normed


# ----------------------------------------------------------------------------
if __name__ == "__main__":
    cfg = Config(in_dim=6, num_layers=2, num_channels=32, num_heads=4)
    B, N = 2, 128

    key = jax.random.PRNGKey(0)
    kp, k1, k2 = jax.random.split(key, 3)
    params = init_params(kp, cfg)
    corr_pos = jax.random.normal(k1, (B, N, cfg.in_dim), jnp.float32)
    spatial_compat = jax.random.normal(k2, (B, N, N), jnp.float32)

    corr_feat, normed = nonlocal_net_forward(params, corr_pos, spatial_compat, cfg)
    jax.block_until_ready((corr_feat, normed))

    ref_feat, ref_normed = ref_forward(params, corr_pos, spatial_compat, cfg)
    # Tolerance accounts for bf16 MXU operands (weights/activations/sc),
    # f32 accumulation and the EUP approximate reciprocal in the softmax.
    assert np.allclose(np.asarray(corr_feat, np.float64), ref_feat,
                       rtol=6e-2, atol=6e-2), "corr_feat mismatch"
    assert np.allclose(np.asarray(normed, np.float64), ref_normed,
                       rtol=6e-2, atol=6e-2), "normed_corr_feat mismatch"

    print("KERNEL_OK")
</pallas_src>

<mosaic_0001>
module attributes {stable_mosaic.version = 11 : i64} {
  func.func @_pointcn_qkv_kernel(%arg0: i32, %arg1: memref<6x256xf32, #tpu.memory_space<vmem>>, %arg2: memref<32x6xbf16, #tpu.memory_space<vmem>>, %arg3: memref<32x1xf32, #tpu.memory_space<vmem>>, %arg4: memref<96x32xbf16, #tpu.memory_space<vmem>>, %arg5: memref<96x1xf32, #tpu.memory_space<vmem>>, %arg6: memref<32x256xf32, #tpu.memory_space<vmem>>, %arg7: memref<32x256xbf16, #tpu.memory_space<vmem>>, %arg8: memref<32x256xbf16, #tpu.memory_space<vmem>>, %arg9: memref<32x256xbf16, #tpu.memory_space<vmem>>) attributes {dimension_semantics = [#tpu.dimension_semantics<parallel>], iteration_bounds = array<i64: 1>, scalar_prefetch = 0 : i64, scratch_operands = 0 : i64, tpu.core_type = #tpu.core_type<tc>, window_params = [{transform_indices = @transform_0, window_bounds = array<i64: 6, 256>}, {pipeline_mode = #tpu.pipeline_mode<synchronous>, transform_indices = @transform_1, window_bounds = array<i64: 32, 6>}, {pipeline_mode = #tpu.pipeline_mode<synchronous>, transform_indices = @transform_2, window_bounds = array<i64: 32, 1>}, {pipeline_mode = #tpu.pipeline_mode<synchronous>, transform_indices = @transform_3, window_bounds = array<i64: 96, 32>}, {pipeline_mode = #tpu.pipeline_mode<synchronous>, transform_indices = @transform_4, window_bounds = array<i64: 96, 1>}, {transform_indices = @transform_5, window_bounds = array<i64: 32, 256>}, {transform_indices = @transform_6, window_bounds = array<i64: 32, 256>}, {transform_indices = @transform_7, window_bounds = array<i64: 32, 256>}, {transform_indices = @transform_8, window_bounds = array<i64: 32, 256>}]} {
    %c0 = arith.constant 0 : index
    %c0_0 = arith.constant 0 : index
    %0 = vector.load %arg1[%c0, %c0_0] : memref<6x256xf32, #tpu.memory_space<vmem>>, vector<6x256xf32>
    %1 = arith.truncf %0 : vector<6x256xf32> to vector<6x256xbf16>
    %c0_1 = arith.constant 0 : index
    %c0_2 = arith.constant 0 : index
    %2 = vector.load %arg2[%c0_1, %c0_2] : memref<32x6xbf16, #tpu.memory_space<vmem>>, vector<32x6xbf16>
    %cst = arith.constant dense<0.000000e+00> : vector<32x256xf32>
    %3 = tpu.matmul %2, %1, %cst {dimension_numbers = #tpu.dot_dimension_numbers<[1], [0], [0], [1], [0, 0, 1, 1], [], []>} : vector<32x6xbf16>, vector<6x256xbf16>, vector<32x256xf32> -> vector<32x256xf32>
    %c0_3 = arith.constant 0 : index
    %c0_4 = arith.constant 0 : index
    %4 = vector.load %arg3[%c0_3, %c0_4] : memref<32x1xf32, #tpu.memory_space<vmem>>, vector<32x1xf32>
    %5 = vector.broadcast %4 : vector<32x1xf32> to vector<32x256xf32>
    %6 = arith.addf %3, %5 : vector<32x256xf32>
    %cst_5 = arith.constant 0.000000e+00 : f32
    %7 = vector.broadcast %cst_5 : f32 to vector<32x256xf32>
    %8 = arith.maximumf %6, %7 : vector<32x256xf32>
    %c0_6 = arith.constant 0 : index
    %c0_7 = arith.constant 0 : index
    %9 = vector.load %arg6[%c0_6, %c0_7] : memref<32x256xf32, #tpu.memory_space<vmem>>, vector<32x256xf32>
    tpu.vector_store %arg6[%c0_6, %c0_7], %8 {strides = array<i32>} : memref<32x256xf32, #tpu.memory_space<vmem>>, vector<32x256xf32>,
    %c0_8 = arith.constant 0 : index
    %c0_9 = arith.constant 0 : index
    %10 = vector.load %arg4[%c0_8, %c0_9] : memref<96x32xbf16, #tpu.memory_space<vmem>>, vector<96x32xbf16>
    %11 = arith.truncf %8 : vector<32x256xf32> to vector<32x256xbf16>
    %cst_10 = arith.constant dense<0.000000e+00> : vector<96x256xf32>
    %12 = tpu.matmul %10, %11, %cst_10 {dimension_numbers = #tpu.dot_dimension_numbers<[1], [0], [0], [1], [0, 0, 1, 1], [], []>} : vector<96x32xbf16>, vector<32x256xbf16>, vector<96x256xf32> -> vector<96x256xf32>
    %c0_11 = arith.constant 0 : index
    %c0_12 = arith.constant 0 : index
    %13 = vector.load %arg5[%c0_11, %c0_12] : memref<96x1xf32, #tpu.memory_space<vmem>>, vector<96x1xf32>
    %14 = vector.broadcast %13 : vector<96x1xf32> to vector<96x256xf32>
    %15 = arith.addf %12, %14 : vector<96x256xf32>
    %16 = vector.extract_strided_slice %15 {offsets = [0, 0], sizes = [32, 256], strides = [1, 1]} : vector<96x256xf32> to vector<32x256xf32>
    %17 = arith.truncf %16 : vector<32x256xf32> to vector<32x256xbf16>
    %c0_13 = arith.constant 0 : index
    %c0_14 = arith.constant 0 : index
    %18 = vector.load %arg7[%c0_13, %c0_14] : memref<32x256xbf16, #tpu.memory_space<vmem>>, vector<32x256xbf16>
    tpu.vector_store %arg7[%c0_13, %c0_14], %17 {strides = array<i32>} : memref<32x256xbf16, #tpu.memory_space<vmem>>, vector<32x256xbf16>,
    %19 = vector.extract_strided_slice %15 {offsets = [32, 0], sizes = [32, 256], strides = [1, 1]} : vector<96x256xf32> to vector<32x256xf32>
    %20 = arith.truncf %19 : vector<32x256xf32> to vector<32x256xbf16>
    %c0_15 = arith.constant 0 : index
    %c0_16 = arith.constant 0 : index
    %21 = vector.load %arg8[%c0_15, %c0_16] : memref<32x256xbf16, #tpu.memory_space<vmem>>, vector<32x256xbf16>
    tpu.vector_store %arg8[%c0_15, %c0_16], %20 {strides = array<i32>} : memref<32x256xbf16, #tpu.memory_space<vmem>>, vector<32x256xbf16>,
    %22 = vector.extract_strided_slice %15 {offsets = [64, 0], sizes = [32, 256], strides = [1, 1]} : vector<96x256xf32> to vector<32x256xf32>
    %23 = arith.truncf %22 : vector<32x256xf32> to vector<32x256xbf16>
    %c0_17 = arith.constant 0 : index
    %c0_18 = arith.constant 0 : index
    %24 = vector.load %arg9[%c0_17, %c0_18] : memref<32x256xbf16, #tpu.memory_space<vmem>>, vector<32x256xbf16>
    tpu.vector_store %arg9[%c0_17, %c0_18], %23 {strides = array<i32>} : memref<32x256xbf16, #tpu.memory_space<vmem>>, vector<32x256xbf16>,
    return
  }
  func.func @transform_0(%arg0: i32) -> (i32, i32) {
    %c0_i32 = arith.constant 0 : i32
    %c0_i32_0 = arith.constant 0 : i32
    return %c0_i32, %arg0 : i32, i32
  }
  func.func @transform_1(%arg0: i32) -> (i32, i32) {
    %c0_i32 = arith.constant 0 : i32
    %c0_i32_0 = arith.constant 0 : i32
    %c0_i32_1 = arith.constant 0 : i32
    return %c0_i32, %c0_i32_0 : i32, i32
  }
  func.func @transform_2(%arg0: i32) -> (i32, i32) {
    %c0_i32 = arith.constant 0 : i32
    %c0_i32_0 = arith.constant 0 : i32
    %c0_i32_1 = arith.constant 0 : i32
    return %c0_i32, %c0_i32_0 : i32, i32
  }
  func.func @transform_3(%arg0: i32) -> (i32, i32) {
    %c0_i32 = arith.constant 0 : i32
    %c0_i32_0 = arith.constant 0 : i32
    %c0_i32_1 = arith.constant 0 : i32
    return %c0_i32, %c0_i32_0 : i32, i32
  }
  func.func @transform_4(%arg0: i32) -> (i32, i32) {
    %c0_i32 = arith.constant 0 : i32
    %c0_i32_0 = arith.constant 0 : i32
    %c0_i32_1 = arith.constant 0 : i32
    return %c0_i32, %c0_i32_0 : i32, i32
  }
  func.func @transform_5(%arg0: i32) -> (i32, i32) {
    %c0_i32 = arith.constant 0 : i32
    %c0_i32_0 = arith.constant 0 : i32
    return %c0_i32, %arg0 : i32, i32
  }
  func.func @transform_6(%arg0: i32) -> (i32, i32) {
    %c0_i32 = arith.constant 0 : i32
    %c0_i32_0 = arith.constant 0 : i32
    return %c0_i32, %arg0 : i32, i32
  }
  func.func @transform_7(%arg0: i32) -> (i32, i32) {
    %c0_i32 = arith.constant 0 : i32
    %c0_i32_0 = arith.constant 0 : i32
    return %c0_i32, %arg0 : i32, i32
  }
  func.func @transform_8(%arg0: i32) -> (i32, i32) {
    %c0_i32 = arith.constant 0 : i32
    %c0_i32_0 = arith.constant 0 : i32
    return %c0_i32, %arg0 : i32, i32
  }
}

</mosaic_0001>

<bundles_post_ra>
// kernel: tpu_custom_call.1
= control target key start
LH: loop header
LB: loop body
LE: loop exit
PB: predicated region body
PF: predicated region fallthrough
CT: control target
= control target key end

     0   :  { %14 = vsyncpa [#allocation3], 0  ;;  %s903_s0 = inlined_call_operand.vmem [shape: f32[6,256], index: 0, kind: input, shape index: {}]   ;;  %s904_s1 = inlined_call_operand.vmem [shape: bf16[32,6], index: 1, kind: input, shape index: {}]   ;;  %s905_s2 = inlined_call_operand.vmem [shape: f32[32,1], index: 2, kind: input, shape index: {}]   ;;  %s906_s3 = inlined_call_operand.vmem [shape: bf16[96,32], index: 3, kind: input, shape index: {}]   ;;  %s907_s4 = inlined_call_operand.vmem [shape: f32[96,1], index: 4, kind: input, shape index: {}]   ;;  %s908_s5 = inlined_call_operand.hbm [shape: f32[32,256], index: 5, kind: output, shape index: {0}]   ;;  %s909_s6 = inlined_call_operand.hbm [shape: bf16[32,256], index: 6, kind: output, shape index: {1}]   ;;  %s910_s7 = inlined_call_operand.hbm [shape: bf16[32,256], index: 7, kind: output, shape index: {2}]   ;;  %s911_s8 = inlined_call_operand.hbm [shape: bf16[32,256], index: 8, kind: output, shape index: {3}]  }
   0x1   :  { %15 = vsyncpa [#allocation5], 0  ;;  %v29_v0 = vld [vmem:[%s903_s0 + $0x8] sm:$0x3f]  ;;  %vm77_vm0 = vcmask 1042432   ;;  %v688_v4 = vmov 0  }
   0x2   :  { %v28_v1 = vld [vmem:[%s903_s0] sm:$0x3f]  ;;  %v31_v2 = vpack.c.bf16 %v29_v0, %v29_v0  ;;  %116 = vmatprep.mubr.bf16.mxu0 %v688_v4  ;;  %584 = vset.pattern.permute.xlu0 %v688_v4  ;;  %v38_v8 = vld [vmem:[%s905_s2 + $0x10] sm:$0xff]  ;;  %vm70_vm1 = vcmask 48128   ;;  %v37_v9 = vld [vmem:[%s905_s2 + $0x8] sm:$0xff] }
   0x3   :  { %v30_v3 = vpack.c.bf16 %v28_v1, %v28_v1  ;;  %585 = vset.pattern.permute.xlu1 %v688_v4  ;;  %342 = vmatprep.mubr.bf16.mxu1 %v688_v4  ;;  %v586_v6 = vld [vmem:[%s904_s1] sm:$0xff]   ;;  %v39_v10 = vld [vmem:[%s905_s2 + $0x18] sm:$0xff]  ;;  %v170_v12 = vld [vmem:[%s907_s4 + $0x8] sm:$0xff] }
   0x4   :  { %532 = vmatprep.subr.msk.bf16.mxu0 %vm77_vm0, %v31_v2  ;;  %v36_v7 = vld [vmem:[%s905_s2] sm:$0xff]  ;;  %52 = vperm.xlu1 %585, %v38_v8   ;;  %v587_v13 = vld [vmem:[%s904_s1 + $0x8] sm:$0xff]  }
   0x5   :  { %v79_v5 = vsel %vm77_vm0, %v30_v3, 0  ;;  %42 = vperm.xlu0 %584, %v36_v7   ;;  %v169_v11 = vld [vmem:[%s907_s4] sm:$0xff] }
   0x6   :  { %85 = vmatpush1.bf16.msra.mxu0 %v79_v5 }
   0x8   :  { %57 = vperm.xlu1 %585, %v39_v10  }
   0x9   :  { %533 = vmatmul.mubr.msk.bf16.vlgmr.msra.gmra.mrb[0].mxu0 %vm70_vm1, %v586_v6  ;;  %47 = vperm.xlu0 %584, %v37_v9  }
   0xa   :  { %126 = vmatprep.mubr.bf16.mxu0 %v688_v4 }
   0xd   :  { %183 = vperm.xlu0 %584, %v169_v11  }
   0xe   :  { %16 = vsyncpa [#allocation8], 0  ;;  %188 = vperm.xlu1 %585, %v170_v12   ;;  %v171_v14 = vld [vmem:[%s907_s4 + $0x10] sm:$0xff]  ;;  %v172_v15 = vld [vmem:[%s907_s4 + $0x18] sm:$0xff]  ;;  %vm271_vm2 = vcmask 261120   ;;  %s689_s28 = smov [#allocation2]  }
   0xf   :  { %v173_v16 = vld [vmem:[%s907_s4 + $0x20] sm:$0xff]  ;;  %v174_v17 = vld [vmem:[%s907_s4 + $0x28] sm:$0xff]  ;;  %v175_v18 = vld [vmem:[%s907_s4 + $0x30] sm:$0xff]  ;;  %s472_s29 = sshll.u32 %s689_s28, 4  ;;  %s473_s29 = int_to_ptr.vmem [resolvable:$true] %s472_s29 }
  0x10   :  { %v176_v19 = vld [vmem:[%s907_s4 + $0x38] sm:$0xff]  ;;  %v177_v20 = vld [vmem:[%s907_s4 + $0x40] sm:$0xff]  ;;  %v178_v21 = vld [vmem:[%s907_s4 + $0x48] sm:$0xff]  ;;  %s594_s30 = scalar_lea.vmem %s473_s29, 1024  ;;  %p599_p1 = scmp.lt.s32.totalorder %s473_s29, %s473_s29 }
  0x11   :  { %534 = vmatmul.mubr.msk.bf16.gmra.mrb[4].mxu0 %vm70_vm1, %v587_v13  ;;  %193 = vperm.xlu0 %584, %v171_v14   ;;  %v179_v22 = vld [vmem:[%s907_s4 + $0x50] sm:$0xff]  ;;  %v180_v23 = vld [vmem:[%s907_s4 + $0x58] sm:$0xff]  ;;  %v588_v56 = vld [vmem:[%s906_s3] sm:$0xff]   ;;  %p595_p0 = scmp.ne.s32.totalorder %s473_s29, %s594_s30  ;;  %p600_p2 = scmp.lt.s32.totalorder %s594_s30, %s594_s30 }
  0x12   :  { %322 = vmatprep.mubr.bf16.mxu0 %v688_v4  ;;  %198 = vperm.xlu1 %585, %v172_v15   ;;  %v589_v57 = vld [vmem:[%s906_s3 + $0x10] sm:$0xff]   ;;  %v590_v58 = vld [vmem:[%s906_s3 + $0x8] sm:$0xff]   ;;  %v591_v59 = vld [vmem:[%s906_s3 + $0x18] sm:$0xff]  }
  0x13   :  { %v592_v60 = vld [vmem:[%s906_s3 + $0x20] sm:$0xff]   ;;  %v593_v61 = vld [vmem:[%s906_s3 + $0x28] sm:$0xff]   ;;  %p601_p3 = por %p600_p2, %p599_p1 }
  0x15   :  { %203 = vperm.xlu0 %584, %v173_v16   ;;  %p602_p4 = pnand %p601_p3, %p595_p0 }
  0x16   :  { %208 = vperm.xlu1 %585, %v174_v17  }
  0x19   :  { %213 = vperm.xlu0 %584, %v175_v18  }
  0x1a   :  { %218 = vperm.xlu1 %585, %v176_v19  }
  0x1d   :  { %223 = vperm.xlu0 %584, %v177_v20  }
  0x1e   :  { %228 = vperm.xlu1 %585, %v178_v21  }
  0x21   :  { %233 = vperm.xlu0 %584, %v179_v22  }
  0x22   :  { %238 = vperm.xlu1 %585, %v180_v23  }
  0x83   :  { %v53_v34 = vpop.permute.xlu1 %52 }
  0x84   :  { %v43_v24 = vpop.permute.xlu0 %42 }
  0x87   :  { %v58_v44 = vpop.permute.xlu1 %57 }
  0x88   :  { %v48_v28 = vpop.permute.xlu0 %47 }
  0xdc   :  { %v118_v25 = vpop.f32.mrb[0].mxu0 }
  0xdd   :  { %v119_v26 = vadd.f32 %v118_v25, %v43_v24  ;;  %v120_v27 = vpop.f32.mrb[1].mxu0 }
  0xde   :  { %v121_v29 = vadd.f32 %v120_v27, %v43_v24  ;;  %v122_v30 = vpop.f32.mrb[2].mxu0 }
  0xdf   :  { %v137_v31 = vmax.f32 %v119_v26, 0.0  ;;  %v123_v32 = vadd.f32 %v122_v30, %v48_v28  ;;  %v124_v33 = vpop.f32.mrb[3].mxu0 }
  0xe0   :  { %v138_v35 = vmax.f32 %v121_v29, 0.0  ;;  %v125_v36 = vadd.f32 %v124_v33, %v48_v28 }
  0xe1   :  { %145 = vst [vmem:[#allocation2] sm:$0xff] %v137_v31  ;;  %v139_v37 = vmax.f32 %v123_v32, 0.0 }
  0xe2   :  { %146 = vst [vmem:[#allocation2 + $0x8] sm:$0xff] %v138_v35  ;;  %v140_v38 = vmax.f32 %v125_v36, 0.0 }
  0xe3   :  { %147 = vst [vmem:[#allocation2 + $0x10] sm:$0xff] %v139_v37  ;;  %v165_v39 = vpack.c.bf16 %v139_v37, %v137_v31 }
  0xe4   :  { %148 = vst [vmem:[#allocation2 + $0x18] sm:$0xff] %v140_v38  ;;  %v166_v40 = vpack.c.bf16 %v140_v38, %v138_v35  ;;  %v128_v41 = vpop.f32.mrb[4].mxu0 }
  0xe5   :  { %v129_v42 = vadd.f32 %v128_v41, %v53_v34  ;;  %v130_v43 = vpop.f32.mrb[5].mxu0 }
  0xe6   :  { %v131_v45 = vadd.f32 %v130_v43, %v53_v34  ;;  %v132_v46 = vpop.f32.mrb[6].mxu0  ;;  %290 = vmatprep.subr.bf16.mxu0 %v166_v40  ;;  %571 = vmatprep.subr.bf16.mxu1 %v166_v40 }
  0xe7   :  { %v141_v47 = vmax.f32 %v129_v42, 0.0  ;;  %v133_v48 = vadd.f32 %v132_v46, %v58_v44  ;;  %v134_v49 = vpop.f32.mrb[7].mxu0  ;;  %291 = vmatpush1.bf16.msra.mxu0 %v165_v39  ;;  %573 = vmatpush1.bf16.msra.mxu1 %v165_v39 }
  0xe8   :  { %v142_v50 = vmax.f32 %v131_v45, 0.0  ;;  %v135_v51 = vadd.f32 %v134_v49, %v58_v44 }
  0xe9   :  { %149 = vst [vmem:[#allocation2 + $0x20] sm:$0xff] %v141_v47  ;;  %v143_v52 = vmax.f32 %v133_v48, 0.0 }
  0xea   :  { %150 = vst [vmem:[#allocation2 + $0x28] sm:$0xff] %v142_v50  ;;  %v144_v53 = vmax.f32 %v135_v51, 0.0 }
  0xeb   :  { %151 = vst [vmem:[#allocation2 + $0x30] sm:$0xff] %v143_v52  ;;  %v167_v54 = vpack.c.bf16 %v143_v52, %v141_v47 }
  0xec   :  { %152 = vst [vmem:[#allocation2 + $0x38] sm:$0xff] %v144_v53  ;;  %v168_v55 = vpack.c.bf16 %v144_v53, %v142_v50 }
  0xee   :  { %292 = vmatprep.subr.bf16.mxu0 %v168_v55  ;;  %572 = vmatprep.subr.bf16.mxu1 %v168_v55 }
  0xef   :  { %293 = vmatpush1.bf16.msra.mxu0 %v167_v54  ;;  %574 = vmatpush1.bf16.msra.mxu1 %v167_v54 }
  0xf2   :  { %541 = vmatmul.mubr.msk.bf16.vlgmr.msra.gmra.mrb[8].mxu0 %vm271_vm2, %v588_v56  ;;  %543 = vmatmul.mubr.msk.bf16.vlgmr.msra.gmra.mrb[0].mxu1 %vm271_vm2, %v589_v57 }
  0xf3   :  { %332 = vmatprep.mubr.bf16.mxu0 %v688_v4  ;;  %352 = vmatprep.mubr.bf16.mxu1 %v688_v4 }
  0xfa   :  { %542 = vmatmul.mubr.msk.bf16.gmra.mrb[12].mxu0 %vm271_vm2, %v590_v58  ;;  %544 = vmatmul.mubr.msk.bf16.gmra.mrb[4].mxu1 %vm271_vm2, %v591_v59 }
  0xfb   :  { %362 = vmatprep.mubr.bf16.mxu1 %v688_v4 }
 0x102   :  { %545 = vmatmul.mubr.msk.bf16.gmra.mrb[8].mxu1 %vm271_vm2, %v592_v60 }
 0x103   :  { %372 = vmatprep.mubr.bf16.mxu1 %v688_v4 }
 0x10a   :  { %546 = vmatmul.mubr.msk.bf16.gmra.mrb[12].mxu1 %vm271_vm2, %v593_v61 }
 0x10b   :  { %605 = shalt.err (!%p602_p4)
}
 0x10c   :  { %s606_s11 = scalar_lea.hbm %s908_s5, 1024 }
 0x10d   :  { %p607_p5 = scmp.ne.s32.totalorder %s908_s5, %s606_s11  ;;  %p610_p6 = scmp.lt.u32.totalorder %s606_s11, %s908_s5 }
 0x10f   :  { %p612_p7 = pnand %p610_p6, %p607_p5 }
 0x111   :  { %615 = shalt.err (!%p612_p7)
}
 0x112   :  { %s690_s14 = smov 256   ;;  %s691_s15 = smov 16   ;;  %v184_v62 = vpop.permute.xlu0 %183  ;;  %v189_v63 = vpop.permute.xlu1 %188 }
 0x113   :  { %478 = dma.vmem_to_hbm [thread:$0]  %s473_s29, 1024, %s908_s5, [#allocation3], %s690_s14, %s690_s14, %s691_s15  }
 0x114   :  { %s692_s5 = smov [#allocation4]   ;;  %s693_s4 = smov [#allocation6]  }
 0x115   :  { %s484_s18 = sshll.u32 %s692_s5, 4  ;;  %s496_s19 = sshll.u32 %s693_s4, 4  ;;  %s844_s18 = int_to_ptr.vmem [resolvable:$true] %s484_s18  ;;  %s846_s19 = int_to_ptr.vmem [resolvable:$true] %s496_s19 }
 0x116   :  { %v194_v0 = vpop.permute.xlu0 %193  ;;  %v199_v1 = vpop.permute.xlu1 %198  ;;  %s616_s20 = scalar_lea.vmem %s844_s18, 512  ;;  %p621_p9 = scmp.lt.s32.totalorder %s844_s18, %s844_s18 }
 0x117   :  { %p617_p8 = scmp.ne.s32.totalorder %s844_s18, %s616_s20  ;;  %p622_p10 = scmp.lt.s32.totalorder %s616_s20, %s616_s20 }
 0x119   :  { %p623_p11 = por %p622_p10, %p621_p9 }
 0x11a   :  { %v204_v2 = vpop.permute.xlu0 %203  ;;  %v209_v3 = vpop.permute.xlu1 %208 }
 0x11b   :  { %p624_p12 = pnand %p623_p11, %p617_p8 }
 0x11e   :  { %v214_v24 = vpop.permute.xlu0 %213  ;;  %v219_v25 = vpop.permute.xlu1 %218 }
 0x122   :  { %v224_v46 = vpop.permute.xlu0 %223 }
 0x1c5   :  { %v324_v4 = vpop.f32.mrb[8].mxu0  ;;  %v344_v5 = vpop.f32.mrb[0].mxu1 }
 0x1c6   :  { %v325_v6 = vadd.f32 %v324_v4, %v184_v62  ;;  %v345_v7 = vadd.f32 %v344_v5, %v204_v2  ;;  %v326_v8 = vpop.f32.mrb[9].mxu0  ;;  %v346_v9 = vpop.f32.mrb[1].mxu1 }
 0x1c7   :  { %v327_v10 = vadd.f32 %v326_v8, %v184_v62  ;;  %v347_v11 = vadd.f32 %v346_v9, %v204_v2  ;;  %v328_v12 = vpop.f32.mrb[10].mxu0  ;;  %v348_v13 = vpop.f32.mrb[2].mxu1 }
 0x1c8   :  { %v329_v14 = vadd.f32 %v328_v12, %v189_v63  ;;  %v349_v15 = vadd.f32 %v348_v13, %v209_v3  ;;  %v330_v16 = vpop.f32.mrb[11].mxu0  ;;  %v350_v17 = vpop.f32.mrb[3].mxu1 }
 0x1c9   :  { %v559_v18 = vpack.c.bf16 %v327_v10, %v325_v6  ;;  %v563_v19 = vpack.c.bf16 %v347_v11, %v345_v7  ;;  %v331_v20 = vadd.f32 %v330_v16, %v189_v63  ;;  %v351_v21 = vadd.f32 %v350_v17, %v209_v3 }
 0x1cb   :  { %407 = vst [vmem:[#allocation4] sm:$0xff] %v559_v18  ;;  %435 = vst [vmem:[#allocation6] sm:$0xff] %v563_v19  ;;  %v560_v22 = vpack.c.bf16 %v331_v20, %v329_v14  ;;  %v564_v23 = vpack.c.bf16 %v351_v21, %v349_v15 }
 0x1cd   :  { %408 = vst [vmem:[#allocation4 + $0x8] sm:$0xff] %v560_v22  ;;  %436 = vst [vmem:[#allocation6 + $0x8] sm:$0xff] %v564_v23  ;;  %v334_v26 = vpop.f32.mrb[12].mxu0  ;;  %v354_v27 = vpop.f32.mrb[4].mxu1 }
 0x1ce   :  { %v335_v28 = vadd.f32 %v334_v26, %v194_v0  ;;  %v355_v29 = vadd.f32 %v354_v27, %v214_v24  ;;  %v336_v30 = vpop.f32.mrb[13].mxu0  ;;  %v356_v31 = vpop.f32.mrb[5].mxu1 }
 0x1cf   :  { %v337_v32 = vadd.f32 %v336_v30, %v194_v0  ;;  %v357_v33 = vadd.f32 %v356_v31, %v214_v24  ;;  %v338_v34 = vpop.f32.mrb[14].mxu0  ;;  %v358_v35 = vpop.f32.mrb[6].mxu1 }
 0x1d0   :  { %v339_v36 = vadd.f32 %v338_v34, %v199_v1  ;;  %v359_v37 = vadd.f32 %v358_v35, %v219_v25  ;;  %v340_v38 = vpop.f32.mrb[15].mxu0  ;;  %v360_v39 = vpop.f32.mrb[7].mxu1 }
 0x1d1   :  { %v561_v40 = vpack.c.bf16 %v337_v32, %v335_v28  ;;  %v565_v41 = vpack.c.bf16 %v357_v33, %v355_v29  ;;  %v341_v42 = vadd.f32 %v340_v38, %v199_v1  ;;  %v361_v43 = vadd.f32 %v360_v39, %v219_v25 }
 0x1d3   :  { %409 = vst [vmem:[#allocation4 + $0x10] sm:$0xff] %v561_v40  ;;  %437 = vst [vmem:[#allocation6 + $0x10] sm:$0xff] %v565_v41  ;;  %v562_v44 = vpack.c.bf16 %v341_v42, %v339_v36  ;;  %v566_v45 = vpack.c.bf16 %v361_v43, %v359_v37 }
 0x1d5   :  { %410 = vst [vmem:[#allocation4 + $0x18] sm:$0xff] %v562_v44  ;;  %438 = vst [vmem:[#allocation6 + $0x18] sm:$0xff] %v566_v45  ;;  %v364_v47 = vpop.f32.mrb[8].mxu1 }
 0x1d6   :  { %v365_v48 = vadd.f32 %v364_v47, %v224_v46  ;;  %v366_v49 = vpop.f32.mrb[9].mxu1 }
 0x1d7   :  { %627 = shalt.err (!%p624_p12)
}
 0x1d8   :  { %s628_s23 = scalar_lea.hbm %s909_s6, 512 }
 0x1d9   :  { %p629_p13 = scmp.ne.s32.totalorder %s909_s6, %s628_s23  ;;  %p632_p0 = scmp.lt.u32.totalorder %s628_s23, %s909_s6 }
 0x1db   :  { %p634_p1 = pnand %p632_p0, %p629_p13 }
 0x1dd   :  { %637 = shalt.err (!%p634_p1)
}
 0x1de   :  { %s694_s27 = smov 128   ;;  %s695_s1 = smov 8   ;;  %v229_v50 = vpop.permute.xlu1 %228  ;;  %v367_v51 = vadd.f32 %v366_v49, %v224_v46  ;;  %v368_v52 = vpop.f32.mrb[10].mxu1 }
 0x1df   :  { %490 = dma.vmem_to_hbm [thread:$0]  %s844_s18, 512, %s909_s6, [#allocation5], %s694_s27, %s694_s27, %s695_s1  }
 0x1e0   :  { %s638_s30 = scalar_lea.vmem %s846_s19, 512  ;;  %p643_p3 = scmp.lt.s32.totalorder %s846_s19, %s846_s19 }
 0x1e1   :  { %p639_p2 = scmp.ne.s32.totalorder %s846_s19, %s638_s30  ;;  %p644_p4 = scmp.lt.s32.totalorder %s638_s30, %s638_s30 }
 0x1e3   :  { %p645_p5 = por %p644_p4, %p643_p3 }
 0x1e5   :  { %p646_p6 = pnand %p645_p5, %p639_p2 }
 0x1e7   :  { %649 = shalt.err (!%p646_p6)
}
 0x1e8   :  { %s650_s11 = scalar_lea.hbm %s910_s7, 512 }
 0x1e9   :  { %p651_p7 = scmp.ne.s32.totalorder %s910_s7, %s650_s11  ;;  %p654_p8 = scmp.lt.u32.totalorder %s650_s11, %s910_s7 }
 0x1eb   :  { %p656_p9 = pnand %p654_p8, %p651_p7 }
 0x1ed   :  { %659 = shalt.err (!%p656_p9)
}
 0x1ee   :  { %502 = dma.vmem_to_hbm [thread:$0]  %s846_s19, 512, %s910_s7, [#allocation5], %s694_s27, %s694_s27, %s695_s1   ;;  %v369_v53 = vadd.f32 %v368_v52, %v229_v50  ;;  %v370_v54 = vpop.f32.mrb[11].mxu1  ;;  %v567_v55 = vpack.c.bf16 %v367_v51, %v365_v48  ;;  %v234_v58 = vpop.permute.xlu0 %233 }
 0x1ef   :  { %v371_v56 = vadd.f32 %v370_v54, %v229_v50  ;;  %v374_v59 = vpop.f32.mrb[12].mxu1  ;;  %v239_v62 = vpop.permute.xlu1 %238  ;;  %s696_s15 = smov [#allocation7]  }
 0x1f0   :  { %463 = vst [vmem:[#allocation7] sm:$0xff] %v567_v55  ;;  %v375_v60 = vadd.f32 %v374_v59, %v234_v58  ;;  %v376_v61 = vpop.f32.mrb[13].mxu1  ;;  %s508_s16 = sshll.u32 %s696_s15, 4  ;;  %s509_s16 = int_to_ptr.vmem [resolvable:$true] %s508_s16 }
 0x1f1   :  { %v568_v57 = vpack.c.bf16 %v371_v56, %v369_v53  ;;  %v377_v63 = vadd.f32 %v376_v61, %v234_v58  ;;  %v378_v0 = vpop.f32.mrb[14].mxu1  ;;  %s660_s7 = scalar_lea.vmem %s509_s16, 512  ;;  %p665_p11 = scmp.lt.s32.totalorder %s509_s16, %s509_s16 }
 0x1f2   :  { %v379_v1 = vadd.f32 %v378_v0, %v239_v62  ;;  %v380_v2 = vpop.f32.mrb[15].mxu1  ;;  %p661_p10 = scmp.ne.s32.totalorder %s509_s16, %s660_s7  ;;  %p666_p12 = scmp.lt.s32.totalorder %s660_s7, %s660_s7 }
 0x1f3   :  { %464 = vst [vmem:[#allocation7 + $0x8] sm:$0xff] %v568_v57  ;;  %v569_v3 = vpack.c.bf16 %v377_v63, %v375_v60  ;;  %v381_v4 = vadd.f32 %v380_v2, %v239_v62 }
 0x1f4   :  { %p667_p13 = por %p666_p12, %p665_p11 }
 0x1f5   :  { %465 = vst [vmem:[#allocation7 + $0x10] sm:$0xff] %v569_v3  ;;  %v570_v5 = vpack.c.bf16 %v381_v4, %v379_v1 }
 0x1f6   :  { %p668_p0 = pnand %p667_p13, %p661_p10 }
 0x1f7   :  { %466 = vst [vmem:[#allocation7 + $0x18] sm:$0xff] %v570_v5 }
 0x1f8   :  { %671 = shalt.err (!%p668_p0)
}
 0x1f9   :  { %s672_s18 = scalar_lea.hbm %s911_s8, 512 }
 0x1fa   :  { %p673_p1 = scmp.ne.s32.totalorder %s911_s8, %s672_s18  ;;  %p676_p2 = scmp.lt.u32.totalorder %s672_s18, %s911_s8 }
 0x1fc   :  { %p678_p3 = pnand %p676_p2, %p673_p1 }
 0x1fe   :  { %681 = shalt.err (!%p678_p3)
}
 0x1ff   :  { %514 = dma.vmem_to_hbm [thread:$0]  %s509_s16, 512, %s911_s8, [#allocation8], %s694_s27, %s694_s27, %s695_s1  }
 0x200   :  { %682 = dma.done.wait [#allocation3], 1024  }
 0x201   :  { %683 = vsyncadd [#allocation3], 4294966272 }
 0x202   :  { %684 = dma.done.wait [#allocation5], 1024  }
 0x203   :  { %685 = vsyncadd [#allocation5], 4294966272 }
 0x204   :  { %686 = dma.done.wait [#allocation8], 512  }
 0x205   :  { %687 = vsyncadd [#allocation8], 4294966784 }
 0x206   :  { %527 = vsyncpa [#allocation3], 1 }
 0x207   :  { %528 = vsyncpa [#allocation5], 1 }
 0x208   :  { %529 = vsyncpa [#allocation8], 1 }

</bundles_post_ra>
